<compile_context>
chip_gen: v7x
topology: tpu7x:2x2x1
jax: 0.10.0
libtpu: 0.0.40
codegen_flags: <defaults>
</compile_context>

<pallas_src>
import functools

import jax
import jax.numpy as jnp
from jax.experimental import pallas as pl
from jax.experimental.pallas import tpu as pltpu

ALPHA = 1.0
GAMMA = 2.0  # hard-coded as a squaring below (module default gamma=2)
LANES = 128
SUBLANES = 8

# Rows at or below this go through the single-block (no-grid) path.
SINGLE_BLOCK_MAX_ROWS = 1024          # <= 512 KiB per f32 input
# Tiled path: 4096 rows x 128 lanes x 4 B = 2 MiB per input block.
TILE_ROWS = 4096
# 2 inputs x 2 pipeline buffers x 2 MiB = 8 MiB + small outputs; 32 MiB gives
# headroom and is valid on v5e/v6e (128 MiB physical) and v7x (64 MiB).
VMEM_LIMIT_BYTES = 32 * 1024 * 1024


def _focal_elementwise(x, t):
    """Per-element focal loss in f32.

    ce = max(x,0) - x*t + log1p(exp(-|x|))   (stable BCE-with-logits)
    pt = exp(-ce)                            (reuses ce; no divide)
    focal = alpha * (1 - pt)^2 * ce          (gamma == 2)
    """
    e = jnp.exp(-jnp.abs(x))
    ce = jnp.maximum(x, 0.0) - x * t + jnp.log1p(e)
    pt = jnp.exp(-ce)
    one_minus_pt = 1.0 - pt
    return ALPHA * (one_minus_pt * one_minus_pt) * ce


def _focal_block_kernel(x_ref, t_ref, sum_ref, *, valid_lanes, scale):
    """Single block (no grid): sum (optionally pre-scaled) to a SMEM scalar."""
    x = x_ref[...].astype(jnp.float32)
    t = t_ref[...].astype(jnp.float32)
    focal = _focal_elementwise(x, t)
    if valid_lanes is not None:
        # Only used for the (1, 128) sub-lane tail block: lane-only compare.
        lane = jax.lax.broadcasted_iota(jnp.int32, focal.shape, 1)
        focal = jnp.where(lane < valid_lanes, focal, 0.0)
    sum_ref[0, 0] = jnp.sum(focal) * jnp.float32(scale)


def _focal_tiled_kernel(x_ref, t_ref, out_ref, *, n_tiles, tail_rows, tile_rows):
    """One grid step = one tile -> one private (8,128) lane-partial block.

    No cross-step accumulator, so the grid axis is fully parallel (engages
    both TensorCores on v7x; serial-but-cheap on v5e/v6e).
    """
    i = pl.program_id(0)

    def partial(mask_rows):
        x = x_ref[...].astype(jnp.float32)
        t = t_ref[...].astype(jnp.float32)
        focal = _focal_elementwise(x, t)
        if mask_rows is not None:
            # Row-only compare (no per-element index multiply, no overflow).
            row = jax.lax.broadcasted_iota(jnp.int32, focal.shape, 0)
            focal = jnp.where(row < mask_rows, focal, 0.0)
        # Plain VPU adds of (8,128) vregs; no cross-lane reduction in-kernel.
        return jnp.sum(focal.reshape(-1, SUBLANES, LANES), axis=0)

    if tail_rows == tile_rows:
        # Every tile is full: unconditional, mask-free hot loop.
        out_ref[...] = partial(None)
    else:
        @pl.when(i < n_tiles - 1)
        def _():
            out_ref[...] = partial(None)

        @pl.when(i == n_tiles - 1)
        def _():
            out_ref[...] = partial(tail_rows)


def _focal_single_block_sum(x2d, t2d, *, valid_lanes, scale):
    kernel = functools.partial(
        _focal_block_kernel, valid_lanes=valid_lanes, scale=scale)
    out = pl.pallas_call(
        kernel,
        out_shape=jax.ShapeDtypeStruct((1, 1), jnp.float32),
        in_specs=[pl.BlockSpec(memory_space=pltpu.VMEM),
                  pl.BlockSpec(memory_space=pltpu.VMEM)],
        out_specs=pl.BlockSpec(memory_space=pltpu.SMEM),
    )(x2d, t2d)
    return out[0, 0]


def _focal_tiled_sum(x2d, t2d):
    rows = x2d.shape[0]
    # Shrink the tile if the whole input is smaller than the default tile.
    tile_rows = min(TILE_ROWS, ((rows + SUBLANES - 1) // SUBLANES) * SUBLANES)
    n_tiles = pl.cdiv(rows, tile_rows)
    tail_rows = rows - (n_tiles - 1) * tile_rows   # rows in the last tile

    kernel = functools.partial(
        _focal_tiled_kernel, n_tiles=n_tiles, tail_rows=tail_rows,
        tile_rows=tile_rows)
    partials = pl.pallas_call(
        kernel,
        out_shape=jax.ShapeDtypeStruct((n_tiles * SUBLANES, LANES),
                                       jnp.float32),
        grid=(n_tiles,),
        in_specs=[pl.BlockSpec((tile_rows, LANES), lambda i: (i, 0)),
                  pl.BlockSpec((tile_rows, LANES), lambda i: (i, 0))],
        out_specs=pl.BlockSpec((SUBLANES, LANES), lambda i: (i, 0)),
        compiler_params=pltpu.CompilerParams(
            dimension_semantics=("parallel",),
            vmem_limit_bytes=VMEM_LIMIT_BYTES),
    )(x2d, t2d)
    # Tiny XLA reduction over the per-tile lane partials (n_tiles * 4 KiB).
    return jnp.sum(partials)


def focal_loss(inputs, targets):
    """Focal loss with alpha=1, gamma=2, reduction='mean' (scalar f32)."""
    # TODO(synk): reduction='none'/'sum' variants of the module are not
    # implemented; this covers the default 'mean' forward.
    assert inputs.shape == targets.shape
    total = inputs.size
    assert total > 0
    inv_total = 1.0 / float(total)

    flat_x = inputs.reshape(-1)
    flat_t = targets.reshape(-1)

    rem = total % LANES          # sub-lane tail (< 128 elements)
    main = total - rem           # lane-aligned prefix (no padding needed)

    partial_sums = []

    if main:
        rows = main // LANES
        x2d = flat_x[:main].reshape(rows, LANES)
        t2d = flat_t[:main].reshape(rows, LANES)
        if rows <= SINGLE_BLOCK_MAX_ROWS:
            if rem == 0:
                # Fast path: whole problem in one block, mean computed
                # in-kernel via compile-time * (1/total).
                return _focal_single_block_sum(
                    x2d, t2d, valid_lanes=None, scale=inv_total)
            partial_sums.append(
                _focal_single_block_sum(x2d, t2d, valid_lanes=None, scale=1.0))
        else:
            partial_sums.append(_focal_tiled_sum(x2d, t2d))

    if rem:
        # Pad only the < 128-element tail (not the full arrays) to one lane
        # row; padded lanes are masked in-kernel.
        x_tail = jnp.pad(flat_x[main:], (0, LANES - rem)).reshape(1, LANES)
        t_tail = jnp.pad(flat_t[main:], (0, LANES - rem)).reshape(1, LANES)
        partial_sums.append(
            _focal_single_block_sum(x_tail, t_tail, valid_lanes=rem, scale=1.0))

    total_sum = partial_sums[0]
    for p in partial_sums[1:]:
        total_sum = total_sum + p
    return total_sum * jnp.float32(inv_total)


def _focal_loss_ref(inputs, targets):
    x = inputs.astype(jnp.float32)
    t = targets.astype(jnp.float32)
    ce = jnp.maximum(x, 0.0) - x * t + jnp.log1p(jnp.exp(-jnp.abs(x)))
    pt = jnp.exp(-ce)
    return jnp.mean(ALPHA * (1.0 - pt) ** GAMMA * ce)


if __name__ == "__main__":
    key = jax.random.PRNGKey(0)
    k1, k2 = jax.random.split(key)
    # NCHW logits and binary targets, as the PyTorch module would receive.
    x = jax.random.normal(k1, (2, 4, 16, 16), dtype=jnp.float32)
    targets = (jax.random.uniform(k2, (2, 4, 16, 16)) > 0.5).astype(jnp.float32)

    loss = focal_loss(x, targets)
    jax.block_until_ready(loss)

    ref = _focal_loss_ref(x, targets)
    assert jnp.allclose(loss, ref, rtol=1e-5, atol=1e-6), (loss, ref)
    print("KERNEL_OK")
</pallas_src>

<mosaic_0001>
module attributes {stable_mosaic.version = 11 : i64} {
  func.func @_focal_block_kernel(%arg0: memref<16x128xf32, #tpu.memory_space<vmem>>, %arg1: memref<16x128xf32, #tpu.memory_space<vmem>>, %arg2: memref<1x1xf32, #tpu.memory_space<smem>>) attributes {dimension_semantics = [], scalar_prefetch = 0 : i64, scratch_operands = 0 : i64, tpu.core_type = #tpu.core_type<tc>} {
    %c0 = arith.constant 0 : index
    %c0_0 = arith.constant 0 : index
    %0 = vector.load %arg0[%c0, %c0_0] : memref<16x128xf32, #tpu.memory_space<vmem>>, vector<16x128xf32>
    %c0_1 = arith.constant 0 : index
    %c0_2 = arith.constant 0 : index
    %1 = vector.load %arg1[%c0_1, %c0_2] : memref<16x128xf32, #tpu.memory_space<vmem>>, vector<16x128xf32>
    %2 = math.absf %0 : vector<16x128xf32>
    %cst = arith.constant 0.000000e+00 : f32
    %3 = vector.broadcast %cst : f32 to vector<16x128xf32>
    %4 = arith.subf %3, %2 : vector<16x128xf32>
    %5 = math.exp %4 : vector<16x128xf32>
    %cst_3 = arith.constant 0.000000e+00 : f32
    %6 = vector.broadcast %cst_3 : f32 to vector<16x128xf32>
    %7 = arith.maximumf %0, %6 : vector<16x128xf32>
    %8 = arith.mulf %0, %1 : vector<16x128xf32>
    %9 = arith.subf %7, %8 : vector<16x128xf32>
    %10 = math.log1p %5 : vector<16x128xf32>
    %11 = arith.addf %9, %10 : vector<16x128xf32>
    %cst_4 = arith.constant 0.000000e+00 : f32
    %12 = vector.broadcast %cst_4 : f32 to vector<16x128xf32>
    %13 = arith.subf %12, %11 : vector<16x128xf32>
    %14 = math.exp %13 : vector<16x128xf32>
    %cst_5 = arith.constant 1.000000e+00 : f32
    %15 = vector.broadcast %cst_5 : f32 to vector<16x128xf32>
    %16 = arith.subf %15, %14 : vector<16x128xf32>
    %17 = arith.mulf %16, %16 : vector<16x128xf32>
    %cst_6 = arith.constant 1.000000e+00 : f32
    %18 = vector.broadcast %cst_6 : f32 to vector<16x128xf32>
    %19 = arith.mulf %18, %17 : vector<16x128xf32>
    %20 = arith.mulf %19, %11 : vector<16x128xf32>
    %21 = vector.shape_cast %20 : vector<16x128xf32> to vector<1x16x128xf32>
    %cst_7 = arith.constant dense<0.000000e+00> : vector<1xf32>
    %22 = vector.multi_reduction <add>, %21, %cst_7 [1, 2] : vector<1x16x128xf32> to vector<1xf32>
    %23 = vector.shape_cast %22 : vector<1xf32> to vector<1x1x1xf32>
    %24 = vector.extract %23[0, 0, 0] : f32 from vector<1x1x1xf32>
    %cst_8 = arith.constant 4.8828125E-4 : f32
    %25 = arith.mulf %24, %cst_8 : f32
    %c0_9 = arith.constant 0 : index
    %c0_10 = arith.constant 0 : index
    %26 = memref.load %arg2[%c0_9, %c0_10] : memref<1x1xf32, #tpu.memory_space<smem>>
    memref.store %25, %arg2[%c0_9, %c0_10] : memref<1x1xf32, #tpu.memory_space<smem>>
    return
  }
}

</mosaic_0001>

<bundles_post_ra>
// kernel: tpu_custom_call.1
= control target key start
LH: loop header
LB: loop body
LE: loop exit
PB: predicated region body
PF: predicated region fallthrough
CT: control target
= control target key end

     0   :  { %7 = vsyncpa [#allocation3], 0  ;;  %s253_s0 = inlined_call_operand.hbm [shape: f32[16,128], index: 0, kind: input, shape index: {}]   ;;  %s254_s1 = inlined_call_operand.hbm [shape: f32[16,128], index: 1, kind: input, shape index: {}]   ;;  %s255_s2 = inlined_call_operand.hbm [shape: f32[1,1], index: 2, kind: output, shape index: {}]  }
   0x1   :  { %8 = vsyncpa [#allocation6], 0 }
   0x2   :  { %9 = vsyncpa [#allocation4], 0  ;;  %s197_s9 = smov [#allocation2]   ;;  %s137_s13 = scalar_lea.hbm %s253_s0, 256 }
   0x3   :  { %s15_s10 = sshll.u32 %s197_s9, 4  ;;  %p138_p0 = scmp.ne.s32.totalorder %s253_s0, %s137_s13  ;;  %s16_s10 = int_to_ptr.vmem [resolvable:$true] %s15_s10 }
   0x4   :  { %p141_p1 = scmp.lt.u32.totalorder %s137_s13, %s253_s0 }
   0x6   :  { %p143_p2 = pnand %p141_p1, %p138_p0 }
   0x8   :  { %146 = shalt.err (!%p143_p2)
}
   0x9   :  { %s147_s18 = scalar_lea.vmem %s16_s10, 256  ;;  %p152_p4 = scmp.lt.s32.totalorder %s16_s10, %s16_s10 }
   0xa   :  { %p148_p3 = scmp.ne.s32.totalorder %s16_s10, %s147_s18  ;;  %p153_p5 = scmp.lt.s32.totalorder %s147_s18, %s147_s18 }
   0xc   :  { %p154_p6 = por %p153_p5, %p152_p4 }
   0xe   :  { %p155_p7 = pnand %p154_p6, %p148_p3 }
  0x10   :  { %158 = shalt.err (!%p155_p7)
}
  0x11   :  { %s198_s19 = smov 128   ;;  %s199_s20 = smov 8  }
  0x12   :  { %21 = dma.hbm_to_vmem [thread:$0]  %s253_s0, 256, %s16_s10, [#allocation3], %s198_s19, %s198_s19, %s199_s20  }
  0x13   :  { %s200_s23 = smov [#allocation5]   ;;  %s159_s27 = scalar_lea.hbm %s254_s1, 256 }
  0x14   :  { %s27_s24 = sshll.u32 %s200_s23, 4  ;;  %p160_p8 = scmp.ne.s32.totalorder %s254_s1, %s159_s27  ;;  %s28_s24 = int_to_ptr.vmem [resolvable:$true] %s27_s24 }
  0x15   :  { %p163_p9 = scmp.lt.u32.totalorder %s159_s27, %s254_s1 }
  0x17   :  { %p165_p10 = pnand %p163_p9, %p160_p8 }
  0x19   :  { %168 = shalt.err (!%p165_p10)
}
  0x1a   :  { %s169_s4 = scalar_lea.vmem %s28_s24, 256  ;;  %p174_p12 = scmp.lt.s32.totalorder %s28_s24, %s28_s24 }
  0x1b   :  { %p170_p11 = scmp.ne.s32.totalorder %s28_s24, %s169_s4  ;;  %p175_p13 = scmp.lt.s32.totalorder %s169_s4, %s169_s4 }
  0x1d   :  { %p176_p0 = por %p175_p13, %p174_p12 }
  0x1f   :  { %p177_p1 = pnand %p176_p0, %p170_p11 }
  0x21   :  { %180 = shalt.err (!%p177_p1)
}
  0x22   :  { %33 = dma.hbm_to_vmem [thread:$0]  %s254_s1, 256, %s28_s24, [#allocation6], %s198_s19, %s198_s19, %s199_s20  }
  0x23   :  { %191 = dma.done.wait [#allocation3], 256  }
  0x24   :  { %192 = vsyncadd [#allocation3], 4294967040 }
  0x25   :  { %193 = dma.done.wait [#allocation6], 256  }
  0x26   :  { %194 = vsyncadd [#allocation6], 4294967040  ;;  %v40_v0 = vld [vmem:[#allocation2] sm:$0xff]  ;;  %v41_v1 = vld [vmem:[#allocation2 + $0x8] sm:$0xff]  ;;  %s181_s9 = scalar_lea.hbm %s255_s2, 16 }
  0x27   :  { %v44_v2 = vand.u32 2147483647, %v40_v0  ;;  %v45_v3 = vand.u32 2147483647, %v41_v1  ;;  %v42_v14 = vld [vmem:[#allocation5] sm:$0xff]  ;;  %v43_v15 = vld [vmem:[#allocation5 + $0x8] sm:$0xff]  ;;  %p182_p2 = scmp.ne.s32.totalorder %s255_s2, %s181_s9  ;;  %p185_p3 = scmp.lt.u32.totalorder %s181_s9, %s255_s2 }
  0x28   :  { %v52_v17 = vmax.f32 %v40_v0, 0.0  ;;  %v54_v18 = vmul.f32 %v42_v14, %v40_v0  ;;  %v53_v21 = vmax.f32 %v41_v1, 0.0  ;;  %v55_v22 = vmul.f32 %v43_v15, %v41_v1 }
  0x29   :  { %v46_v4 = vsub.f32 0.0, %v44_v2  ;;  %v47_v5 = vsub.f32 0.0, %v45_v3  ;;  %p187_p4 = pnand %p185_p3, %p182_p2 }
  0x2a   :  { %v56_v26 = vsub.f32 %v52_v17, %v54_v18  ;;  %v57_v29 = vsub.f32 %v53_v21, %v55_v22 }
  0x2b   :  { %v48_v6 = vmul.f32 1.442695, %v46_v4  ;;  %v50_v7 = vmul.f32 1.442695, %v47_v5 }
  0x2d   :  { %125 = vpow2.f32 %v48_v6 }
  0x2e   :  { %127 = vpow2.f32 %v50_v7 }
  0x37   :  { %v126_v8 = vpop.eup %125 }
  0x38   :  { %v128_v9 = vpop.eup %127  ;;  %v58_v10 = vadd.f32 1.0, %v126_v8  ;;  %v61_v12 = vmul.f32 -0.5, %v126_v8  ;;  %v64_v19 = vand.u32 2147483647, %v126_v8 }
  0x39   :  { %v67_v11 = vadd.f32 1.0, %v128_v9  ;;  %v70_v13 = vmul.f32 -0.5, %v128_v9  ;;  %v73_v23 = vand.u32 2147483647, %v128_v9 }
  0x3a   :  { %129 = vlog2.f32 %v58_v10  ;;  %v62_v16 = vadd.f32 1.0, %v61_v12  ;;  %vm65_vm0 = vcmp.lt.f32.partialorder %v64_v19, 0.0004427343 }
  0x3b   :  { %131 = vlog2.f32 %v67_v11  ;;  %v71_v20 = vadd.f32 1.0, %v70_v13  ;;  %vm74_vm1 = vcmp.lt.f32.partialorder %v73_v23, 0.0004427343 }
  0x3c   :  { %v63_v24 = vmul.f32 %v126_v8, %v62_v16 }
  0x3d   :  { %v72_v27 = vmul.f32 %v128_v9, %v71_v20 }
  0x44   :  { %v130_v25 = vpop.eup %129 }
  0x45   :  { %v132_v28 = vpop.eup %131  ;;  %v60_v30 = vmul.f32 0.6931472, %v130_v25 }
  0x46   :  { %v69_v31 = vmul.f32 0.6931472, %v132_v28 }
  0x47   :  { %v66_v32 = vsel %vm65_vm0, %v63_v24, %v60_v30 }
  0x48   :  { %v75_v33 = vsel %vm74_vm1, %v72_v27, %v69_v31  ;;  %v76_v34 = vadd.f32 %v66_v32, %v56_v26 }
  0x49   :  { %v77_v35 = vadd.f32 %v75_v33, %v57_v29 }
  0x4a   :  { %v78_v36 = vsub.f32 0.0, %v76_v34 }
  0x4b   :  { %v79_v37 = vsub.f32 0.0, %v77_v35 }
  0x4c   :  { %v80_v38 = vmul.f32 1.442695, %v78_v36 }
  0x4d   :  { %v82_v39 = vmul.f32 1.442695, %v79_v37 }
  0x4e   :  { %133 = vpow2.f32 %v80_v38 }
  0x4f   :  { %135 = vpow2.f32 %v82_v39 }
  0x58   :  { %v134_v40 = vpop.eup %133 }
  0x59   :  { %v136_v41 = vpop.eup %135  ;;  %v84_v42 = vsub.f32 1.0, %v134_v40 }
  0x5a   :  { %v85_v43 = vsub.f32 1.0, %v136_v41 }
  0x5b   :  { %v86_v44 = vmul.f32 %v84_v42, %v84_v42 }
  0x5c   :  { %v87_v45 = vmul.f32 %v85_v43, %v85_v43 }
  0x5d   :  { %v88_v46 = vmul.f32 %v86_v44, %v76_v34 }
  0x5e   :  { %v89_v47 = vmul.f32 %v87_v45, %v77_v35 }
  0x60   :  { %v90_v48 = vadd.f32 %v89_v47, %v88_v46 }
  0x62   :  { %91 = vadd.xlane.f32.xlu0 %v90_v48 }
  0xef   :  { %v92_v49 = vpop.xlane.xlu0 %91 }
  0xf0   :  { %v93_v50 = vrot.slane %v92_v49, 4 }
  0xf2   :  { %v94_v51 = vadd.f32 %v93_v50, %v92_v49 }
  0xf4   :  { %v95_v52 = vrot.slane %v94_v51, 2 }
  0xf6   :  { %v96_v53 = vadd.f32 %v95_v52, %v94_v51 }
  0xf8   :  { %v97_v54 = vrot.slane %v96_v53, 1 }
  0xfa   :  { %v98_v55 = vadd.f32 %v97_v54, %v96_v53 }
  0xfc   :  { %118 = vpush %v98_v55 }
 0x12d   :  { %s119_s1 = spop %118 }
 0x12e   :  { %s100_s6 = smul.f32 0.00048828125, %s119_s1 }
 0x130   :  { %102 = sst [smem:[#allocation7]] %s100_s6 }
 0x131   :  { %190 = shalt.err (!%p187_p4)
}
 0x132   :  { %s201_s14 = smov [#allocation7]  }
 0x133   :  { %110 = dma.smem_to_hbm %s201_s14, 16, %s255_s2, [#allocation4]  }
 0x134   :  { %195 = dma.done.wait [#allocation4], 16  }
 0x135   :  { %196 = vsyncadd [#allocation4], 4294967280 }
 0x136   :  { %114 = sfence }
 0x137   :  { %115 = vsyncpa [#allocation3], 1 }
 0x138   :  { %116 = vsyncpa [#allocation6], 1 }
 0x139   :  { %117 = vsyncpa [#allocation4], 1 }

</bundles_post_ra>
